<compile_context>
chip_gen: v7x
topology: tpu7x:2x2x1
jax: 0.10.0
libtpu: 0.0.40
codegen_flags: <defaults>
</compile_context>

<pallas_src>
import string
import numpy as np
import jax
import jax.numpy as jnp
from jax import lax
from jax.experimental import pallas as pl
from jax.experimental.pallas import tpu as pltpu


def lstm_embed_kernel(x_ref, wih_ref, whh_ref, b_ref, wout_ref, bout_ref,
                      out_ref):
    """One grid step: run the full LSTM recurrence + final linear for a
    (block_b, seq_len) tile of words."""
    TB, S = x_ref.shape
    H4 = wih_ref.shape[1]
    H = H4 // 4

    x = x_ref[...]          # (TB, S)  char indices as f32
    wih = wih_ref[...]      # (1, 4H)  = weight_ih_l0.T   (input_size = 1)
    whh = whh_ref[...]      # (H, 4H)  = weight_hh_l0.T   (hoisted, loop-invariant)
    b = b_ref[...]          # (1, 4H)  = b_ih + b_hh

    # Precompute the input contribution for every timestep: independent of the
    # recurrence, so the scheduler can overlap it with the serial chain.
    gx = [x[:, t:t + 1] * wih + b for t in range(S)]      # each (TB, 4H)

    # Lane mask selecting the 'g' (cell candidate) gate lanes [2H, 3H).
    lane = lax.broadcasted_iota(jnp.int32, (TB, H4), 1)
    g_mask = (lane >= 2 * H) & (lane < 3 * H)

    h = jnp.zeros((TB, H), jnp.float32)
    c = jnp.zeros((TB, H), jnp.float32)

    for t in range(S):                                    # static -> unrolled
        gates = gx[t] + jnp.dot(h, whh, preferred_element_type=jnp.float32)
        # Single EUP tanh pass over the packed gates vreg:
        #   sigmoid(z) = 0.5 * (tanh(z / 2) + 1)   for i, f, o lanes
        #   tanh(z)                                 for g lanes
        tz = jnp.tanh(jnp.where(g_mask, gates, 0.5 * gates))
        act = jnp.where(g_mask, tz, 0.5 * (tz + 1.0))
        i = act[:, 0:H]
        f = act[:, H:2 * H]
        g = act[:, 2 * H:3 * H]
        o = act[:, 3 * H:4 * H]
        c = f * c + i * g
        h = o * jnp.tanh(c)

    # Final projection of the last hidden state, lane-dense 128-wide store.
    out_ref[...] = (jnp.dot(h, wout_ref[...],
                            preferred_element_type=jnp.float32)
                    + bout_ref[...])


def word_embedding_forward(x_batch, w_ih_t, w_hh_t, b, w_out_t, b_out,
                           *, block_b=8):
    """x_batch: (B, seq_len) f32 char indices (B % block_b == 0).
    Returns (B, embedding_dim) f32 — row i is WordEmbeddingModel(word_i)."""
    B, S = x_batch.shape
    H, E = w_out_t.shape
    H4 = 4 * H
    E_PAD = 128  # lane-dense output slab; sliced back to E in the wrapper.

    assert B % block_b == 0, "batch must be a multiple of block_b"

    w_out_pad = jnp.zeros((H, E_PAD), jnp.float32).at[:, :E].set(w_out_t)
    b_out_pad = jnp.zeros((1, E_PAD), jnp.float32).at[:, :E].set(b_out)

    out = pl.pallas_call(
        lstm_embed_kernel,
        out_shape=jax.ShapeDtypeStruct((B, E_PAD), jnp.float32),
        grid_spec=pltpu.PrefetchScalarGridSpec(
            num_scalar_prefetch=0,
            grid=(B // block_b,),
            in_specs=[
                pl.BlockSpec((block_b, S), lambda i: (i, 0)),   # x tile
                pl.BlockSpec((1, H4), lambda i: (0, 0)),        # W_ih^T
                pl.BlockSpec((H, H4), lambda i: (0, 0)),        # W_hh^T
                pl.BlockSpec((1, H4), lambda i: (0, 0)),        # b_ih + b_hh
                pl.BlockSpec((H, E_PAD), lambda i: (0, 0)),     # W_out^T (padded)
                pl.BlockSpec((1, E_PAD), lambda i: (0, 0)),     # b_out   (padded)
            ],
            out_specs=pl.BlockSpec((block_b, E_PAD), lambda i: (i, 0)),
        ),
        compiler_params=pltpu.CompilerParams(
            dimension_semantics=("parallel",)),   # shard word tiles on v7x TCs
    )(x_batch, w_ih_t, w_hh_t, b, w_out_pad, b_out_pad)

    return out[:, :E]


def reference_forward_np(x_batch, w_ih_t, w_hh_t, b, w_out_t, b_out):
    """Pure numpy reference (PyTorch LSTM semantics), batched over words."""
    x = np.asarray(x_batch, np.float32)
    wih = np.asarray(w_ih_t, np.float32)
    whh = np.asarray(w_hh_t, np.float32)
    bb = np.asarray(b, np.float32)
    wout = np.asarray(w_out_t, np.float32)
    bout = np.asarray(b_out, np.float32)
    B, S = x.shape
    H = whh.shape[0]
    sig = lambda z: 1.0 / (1.0 + np.exp(-z))
    h = np.zeros((B, H), np.float32)
    c = np.zeros((B, H), np.float32)
    for t in range(S):
        gates = x[:, t:t + 1] * wih + bb + h @ whh
        i = sig(gates[:, 0:H])
        f = sig(gates[:, H:2 * H])
        g = np.tanh(gates[:, 2 * H:3 * H])
        o = sig(gates[:, 3 * H:4 * H])
        c = f * c + i * g
        h = o * np.tanh(c)
    return h @ wout + bout


if __name__ == "__main__":
    # Small shapes consistent with the module: seq_len=8 chars per word,
    # hidden=32, embedding_dim=10, batch of 16 words (2 grid tiles of 8).
    hidden_dim = 32
    embedding_dim = 10
    seq_len = 8
    batch = 16
    block_b = 8

    # vocab.char2index, built in-script (deterministic).
    chars = string.ascii_lowercase
    char2index = {c: i for i, c in enumerate(chars)}

    # Deterministic batch of 8-letter "words", encoded via char2index exactly
    # like WordEmbeddingModel.forward does on the host side.
    key = jax.random.PRNGKey(0)
    k_words, k_wih, k_whh, k_bih, k_bhh, k_wout, k_bout = jax.random.split(key, 7)
    word_idx = np.asarray(
        jax.random.randint(k_words, (batch, seq_len), 0, len(chars)))
    words = ["".join(chars[j] for j in row) for row in word_idx]
    x_batch = jnp.asarray(
        [[char2index[c] for c in w] for w in words], dtype=jnp.float32)

    # Deterministic synthetic parameters (PyTorch uniform(-k, k), k=1/sqrt(H)).
    kb = 1.0 / np.sqrt(hidden_dim)
    u = lambda kk, shape: jax.random.uniform(kk, shape, jnp.float32, -kb, kb)

    # LSTM params (input_size=1, gate order i,f,g,o), stored pre-transposed.
    w_ih_t = u(k_wih, (1, 4 * hidden_dim))            # = weight_ih_l0.T
    w_hh_t = u(k_whh, (hidden_dim, 4 * hidden_dim))   # = weight_hh_l0.T
    bias = u(k_bih, (1, 4 * hidden_dim)) + u(k_bhh, (1, 4 * hidden_dim))
    # Linear params.
    w_out_t = u(k_wout, (hidden_dim, embedding_dim))  # = linear.weight.T
    b_out = u(k_bout, (1, embedding_dim))

    out = word_embedding_forward(x_batch, w_ih_t, w_hh_t, bias,
                                 w_out_t, b_out, block_b=block_b)
    out = jax.block_until_ready(out)

    ref = reference_forward_np(x_batch, w_ih_t, w_hh_t, bias, w_out_t, b_out)
    assert out.shape == (batch, embedding_dim)
    np.testing.assert_allclose(np.asarray(out), ref, rtol=1e-2, atol=1e-3)

    print("KERNEL_OK")
</pallas_src>

<mosaic_0001>
module attributes {stable_mosaic.version = 11 : i64} {
  func.func @lstm_embed_kernel(%arg0: i32, %arg1: memref<8x8xf32, #tpu.memory_space<vmem>>, %arg2: memref<1x128xf32, #tpu.memory_space<vmem>>, %arg3: memref<32x128xf32, #tpu.memory_space<vmem>>, %arg4: memref<1x128xf32, #tpu.memory_space<vmem>>, %arg5: memref<32x128xf32, #tpu.memory_space<vmem>>, %arg6: memref<1x128xf32, #tpu.memory_space<vmem>>, %arg7: memref<8x128xf32, #tpu.memory_space<vmem>>) attributes {dimension_semantics = [#tpu.dimension_semantics<parallel>], iteration_bounds = array<i64: 2>, scalar_prefetch = 0 : i64, scratch_operands = 0 : i64, tpu.core_type = #tpu.core_type<tc>, window_params = [{transform_indices = @transform_0, window_bounds = array<i64: 8, 8>}, {pipeline_mode = #tpu.pipeline_mode<synchronous>, transform_indices = @transform_1, window_bounds = array<i64: 1, 128>}, {pipeline_mode = #tpu.pipeline_mode<synchronous>, transform_indices = @transform_2, window_bounds = array<i64: 32, 128>}, {pipeline_mode = #tpu.pipeline_mode<synchronous>, transform_indices = @transform_3, window_bounds = array<i64: 1, 128>}, {pipeline_mode = #tpu.pipeline_mode<synchronous>, transform_indices = @transform_4, window_bounds = array<i64: 32, 128>}, {pipeline_mode = #tpu.pipeline_mode<synchronous>, transform_indices = @transform_5, window_bounds = array<i64: 1, 128>}, {transform_indices = @transform_6, window_bounds = array<i64: 8, 128>}]} {
    %c0 = arith.constant 0 : index
    %c0_0 = arith.constant 0 : index
    %0 = vector.load %arg1[%c0, %c0_0] : memref<8x8xf32, #tpu.memory_space<vmem>>, vector<8x8xf32>
    %c0_1 = arith.constant 0 : index
    %c0_2 = arith.constant 0 : index
    %1 = vector.load %arg2[%c0_1, %c0_2] : memref<1x128xf32, #tpu.memory_space<vmem>>, vector<1x128xf32>
    %c0_3 = arith.constant 0 : index
    %c0_4 = arith.constant 0 : index
    %2 = vector.load %arg3[%c0_3, %c0_4] : memref<32x128xf32, #tpu.memory_space<vmem>>, vector<32x128xf32>
    %c0_5 = arith.constant 0 : index
    %c0_6 = arith.constant 0 : index
    %3 = vector.load %arg4[%c0_5, %c0_6] : memref<1x128xf32, #tpu.memory_space<vmem>>, vector<1x128xf32>
    %4 = vector.extract_strided_slice %0 {offsets = [0, 0], sizes = [8, 1], strides = [1, 1]} : vector<8x8xf32> to vector<8x1xf32>
    %5 = vector.broadcast %4 : vector<8x1xf32> to vector<8x128xf32>
    %6 = vector.broadcast %1 : vector<1x128xf32> to vector<8x128xf32>
    %7 = arith.mulf %5, %6 : vector<8x128xf32>
    %8 = vector.broadcast %3 : vector<1x128xf32> to vector<8x128xf32>
    %9 = arith.addf %7, %8 : vector<8x128xf32>
    %10 = vector.extract_strided_slice %0 {offsets = [0, 1], sizes = [8, 1], strides = [1, 1]} : vector<8x8xf32> to vector<8x1xf32>
    %11 = vector.broadcast %10 : vector<8x1xf32> to vector<8x128xf32>
    %12 = vector.broadcast %1 : vector<1x128xf32> to vector<8x128xf32>
    %13 = arith.mulf %11, %12 : vector<8x128xf32>
    %14 = vector.broadcast %3 : vector<1x128xf32> to vector<8x128xf32>
    %15 = arith.addf %13, %14 : vector<8x128xf32>
    %16 = vector.extract_strided_slice %0 {offsets = [0, 2], sizes = [8, 1], strides = [1, 1]} : vector<8x8xf32> to vector<8x1xf32>
    %17 = vector.broadcast %16 : vector<8x1xf32> to vector<8x128xf32>
    %18 = vector.broadcast %1 : vector<1x128xf32> to vector<8x128xf32>
    %19 = arith.mulf %17, %18 : vector<8x128xf32>
    %20 = vector.broadcast %3 : vector<1x128xf32> to vector<8x128xf32>
    %21 = arith.addf %19, %20 : vector<8x128xf32>
    %22 = vector.extract_strided_slice %0 {offsets = [0, 3], sizes = [8, 1], strides = [1, 1]} : vector<8x8xf32> to vector<8x1xf32>
    %23 = vector.broadcast %22 : vector<8x1xf32> to vector<8x128xf32>
    %24 = vector.broadcast %1 : vector<1x128xf32> to vector<8x128xf32>
    %25 = arith.mulf %23, %24 : vector<8x128xf32>
    %26 = vector.broadcast %3 : vector<1x128xf32> to vector<8x128xf32>
    %27 = arith.addf %25, %26 : vector<8x128xf32>
    %28 = vector.extract_strided_slice %0 {offsets = [0, 4], sizes = [8, 1], strides = [1, 1]} : vector<8x8xf32> to vector<8x1xf32>
    %29 = vector.broadcast %28 : vector<8x1xf32> to vector<8x128xf32>
    %30 = vector.broadcast %1 : vector<1x128xf32> to vector<8x128xf32>
    %31 = arith.mulf %29, %30 : vector<8x128xf32>
    %32 = vector.broadcast %3 : vector<1x128xf32> to vector<8x128xf32>
    %33 = arith.addf %31, %32 : vector<8x128xf32>
    %34 = vector.extract_strided_slice %0 {offsets = [0, 5], sizes = [8, 1], strides = [1, 1]} : vector<8x8xf32> to vector<8x1xf32>
    %35 = vector.broadcast %34 : vector<8x1xf32> to vector<8x128xf32>
    %36 = vector.broadcast %1 : vector<1x128xf32> to vector<8x128xf32>
    %37 = arith.mulf %35, %36 : vector<8x128xf32>
    %38 = vector.broadcast %3 : vector<1x128xf32> to vector<8x128xf32>
    %39 = arith.addf %37, %38 : vector<8x128xf32>
    %40 = vector.extract_strided_slice %0 {offsets = [0, 6], sizes = [8, 1], strides = [1, 1]} : vector<8x8xf32> to vector<8x1xf32>
    %41 = vector.broadcast %40 : vector<8x1xf32> to vector<8x128xf32>
    %42 = vector.broadcast %1 : vector<1x128xf32> to vector<8x128xf32>
    %43 = arith.mulf %41, %42 : vector<8x128xf32>
    %44 = vector.broadcast %3 : vector<1x128xf32> to vector<8x128xf32>
    %45 = arith.addf %43, %44 : vector<8x128xf32>
    %46 = vector.extract_strided_slice %0 {offsets = [0, 7], sizes = [8, 1], strides = [1, 1]} : vector<8x8xf32> to vector<8x1xf32>
    %47 = vector.broadcast %46 : vector<8x1xf32> to vector<8x128xf32>
    %48 = vector.broadcast %1 : vector<1x128xf32> to vector<8x128xf32>
    %49 = arith.mulf %47, %48 : vector<8x128xf32>
    %50 = vector.broadcast %3 : vector<1x128xf32> to vector<8x128xf32>
    %51 = arith.addf %49, %50 : vector<8x128xf32>
    %52 = tpu.iota {dimensions = array<i32: 1>} : vector<8x128xi32>
    %c64_i32 = arith.constant 64 : i32
    %53 = vector.broadcast %c64_i32 : i32 to vector<8x128xi32>
    %54 = arith.cmpi sge, %52, %53 : vector<8x128xi32>
    %c96_i32 = arith.constant 96 : i32
    %55 = vector.broadcast %c96_i32 : i32 to vector<8x128xi32>
    %56 = arith.cmpi slt, %52, %55 : vector<8x128xi32>
    %57 = arith.andi %54, %56 : vector<8x128xi1>
    %cst = arith.constant 0.000000e+00 : f32
    %58 = vector.broadcast %cst : f32 to vector<8x32xf32>
    %cst_7 = arith.constant 0.000000e+00 : f32
    %59 = vector.broadcast %cst_7 : f32 to vector<8x32xf32>
    %cst_8 = arith.constant dense<0.000000e+00> : vector<8x128xf32>
    %60 = tpu.matmul %58, %2, %cst_8 {dimension_numbers = #tpu.dot_dimension_numbers<[1], [0], [0], [1], [0, 0, 1, 1], [], []>} : vector<8x32xf32>, vector<32x128xf32>, vector<8x128xf32> -> vector<8x128xf32>
    %61 = arith.addf %9, %60 : vector<8x128xf32>
    %cst_9 = arith.constant 5.000000e-01 : f32
    %62 = vector.broadcast %cst_9 : f32 to vector<8x128xf32>
    %63 = arith.mulf %62, %61 : vector<8x128xf32>
    %64 = arith.select %57, %61, %63 : vector<8x128xi1>, vector<8x128xf32>
    %65 = math.tanh %64 : vector<8x128xf32>
    %cst_10 = arith.constant 1.000000e+00 : f32
    %66 = vector.broadcast %cst_10 : f32 to vector<8x128xf32>
    %67 = arith.addf %65, %66 : vector<8x128xf32>
    %cst_11 = arith.constant 5.000000e-01 : f32
    %68 = vector.broadcast %cst_11 : f32 to vector<8x128xf32>
    %69 = arith.mulf %68, %67 : vector<8x128xf32>
    %70 = arith.select %57, %65, %69 : vector<8x128xi1>, vector<8x128xf32>
    %71 = vector.extract_strided_slice %70 {offsets = [0, 0], sizes = [8, 32], strides = [1, 1]} : vector<8x128xf32> to vector<8x32xf32>
    %72 = vector.extract_strided_slice %70 {offsets = [0, 32], sizes = [8, 32], strides = [1, 1]} : vector<8x128xf32> to vector<8x32xf32>
    %73 = vector.extract_strided_slice %70 {offsets = [0, 64], sizes = [8, 32], strides = [1, 1]} : vector<8x128xf32> to vector<8x32xf32>
    %74 = vector.extract_strided_slice %70 {offsets = [0, 96], sizes = [8, 32], strides = [1, 1]} : vector<8x128xf32> to vector<8x32xf32>
    %75 = arith.mulf %72, %59 : vector<8x32xf32>
    %76 = arith.mulf %71, %73 : vector<8x32xf32>
    %77 = arith.addf %75, %76 : vector<8x32xf32>
    %78 = math.tanh %77 : vector<8x32xf32>
    %79 = arith.mulf %74, %78 : vector<8x32xf32>
    %cst_12 = arith.constant dense<0.000000e+00> : vector<8x128xf32>
    %80 = tpu.matmul %79, %2, %cst_12 {dimension_numbers = #tpu.dot_dimension_numbers<[1], [0], [0], [1], [0, 0, 1, 1], [], []>} : vector<8x32xf32>, vector<32x128xf32>, vector<8x128xf32> -> vector<8x128xf32>
    %81 = arith.addf %15, %80 : vector<8x128xf32>
    %cst_13 = arith.constant 5.000000e-01 : f32
    %82 = vector.broadcast %cst_13 : f32 to vector<8x128xf32>
    %83 = arith.mulf %82, %81 : vector<8x128xf32>
    %84 = arith.select %57, %81, %83 : vector<8x128xi1>, vector<8x128xf32>
    %85 = math.tanh %84 : vector<8x128xf32>
    %cst_14 = arith.constant 1.000000e+00 : f32
    %86 = vector.broadcast %cst_14 : f32 to vector<8x128xf32>
    %87 = arith.addf %85, %86 : vector<8x128xf32>
    %cst_15 = arith.constant 5.000000e-01 : f32
    %88 = vector.broadcast %cst_15 : f32 to vector<8x128xf32>
    %89 = arith.mulf %88, %87 : vector<8x128xf32>
    %90 = arith.select %57, %85, %89 : vector<8x128xi1>, vector<8x128xf32>
    %91 = vector.extract_strided_slice %90 {offsets = [0, 0], sizes = [8, 32], strides = [1, 1]} : vector<8x128xf32> to vector<8x32xf32>
    %92 = vector.extract_strided_slice %90 {offsets = [0, 32], sizes = [8, 32], strides = [1, 1]} : vector<8x128xf32> to vector<8x32xf32>
    %93 = vector.extract_strided_slice %90 {offsets = [0, 64], sizes = [8, 32], strides = [1, 1]} : vector<8x128xf32> to vector<8x32xf32>
    %94 = vector.extract_strided_slice %90 {offsets = [0, 96], sizes = [8, 32], strides = [1, 1]} : vector<8x128xf32> to vector<8x32xf32>
    %95 = arith.mulf %92, %77 : vector<8x32xf32>
    %96 = arith.mulf %91, %93 : vector<8x32xf32>
    %97 = arith.addf %95, %96 : vector<8x32xf32>
    %98 = math.tanh %97 : vector<8x32xf32>
    %99 = arith.mulf %94, %98 : vector<8x32xf32>
    %cst_16 = arith.constant dense<0.000000e+00> : vector<8x128xf32>
    %100 = tpu.matmul %99, %2, %cst_16 {dimension_numbers = #tpu.dot_dimension_numbers<[1], [0], [0], [1], [0, 0, 1, 1], [], []>} : vector<8x32xf32>, vector<32x128xf32>, vector<8x128xf32> -> vector<8x128xf32>
    %101 = arith.addf %21, %100 : vector<8x128xf32>
    %cst_17 = arith.constant 5.000000e-01 : f32
    %102 = vector.broadcast %cst_17 : f32 to vector<8x128xf32>
    %103 = arith.mulf %102, %101 : vector<8x128xf32>
    %104 = arith.select %57, %101, %103 : vector<8x128xi1>, vector<8x128xf32>
    %105 = math.tanh %104 : vector<8x128xf32>
    %cst_18 = arith.constant 1.000000e+00 : f32
    %106 = vector.broadcast %cst_18 : f32 to vector<8x128xf32>
    %107 = arith.addf %105, %106 : vector<8x128xf32>
    %cst_19 = arith.constant 5.000000e-01 : f32
    %108 = vector.broadcast %cst_19 : f32 to vector<8x128xf32>
    %109 = arith.mulf %108, %107 : vector<8x128xf32>
    %110 = arith.select %57, %105, %109 : vector<8x128xi1>, vector<8x128xf32>
    %111 = vector.extract_strided_slice %110 {offsets = [0, 0], sizes = [8, 32], strides = [1, 1]} : vector<8x128xf32> to vector<8x32xf32>
    %112 = vector.extract_strided_slice %110 {offsets = [0, 32], sizes = [8, 32], strides = [1, 1]} : vector<8x128xf32> to vector<8x32xf32>
    %113 = vector.extract_strided_slice %110 {offsets = [0, 64], sizes = [8, 32], strides = [1, 1]} : vector<8x128xf32> to vector<8x32xf32>
    %114 = vector.extract_strided_slice %110 {offsets = [0, 96], sizes = [8, 32], strides = [1, 1]} : vector<8x128xf32> to vector<8x32xf32>
    %115 = arith.mulf %112, %97 : vector<8x32xf32>
    %116 = arith.mulf %111, %113 : vector<8x32xf32>
    %117 = arith.addf %115, %116 : vector<8x32xf32>
    %118 = math.tanh %117 : vector<8x32xf32>
    %119 = arith.mulf %114, %118 : vector<8x32xf32>
    %cst_20 = arith.constant dense<0.000000e+00> : vector<8x128xf32>
    %120 = tpu.matmul %119, %2, %cst_20 {dimension_numbers = #tpu.dot_dimension_numbers<[1], [0], [0], [1], [0, 0, 1, 1], [], []>} : vector<8x32xf32>, vector<32x128xf32>, vector<8x128xf32> -> vector<8x128xf32>
    %121 = arith.addf %27, %120 : vector<8x128xf32>
    %cst_21 = arith.constant 5.000000e-01 : f32
    %122 = vector.broadcast %cst_21 : f32 to vector<8x128xf32>
    %123 = arith.mulf %122, %121 : vector<8x128xf32>
    %124 = arith.select %57, %121, %123 : vector<8x128xi1>, vector<8x128xf32>
    %125 = math.tanh %124 : vector<8x128xf32>
    %cst_22 = arith.constant 1.000000e+00 : f32
    %126 = vector.broadcast %cst_22 : f32 to vector<8x128xf32>
    %127 = arith.addf %125, %126 : vector<8x128xf32>
    %cst_23 = arith.constant 5.000000e-01 : f32
    %128 = vector.broadcast %cst_23 : f32 to vector<8x128xf32>
    %129 = arith.mulf %128, %127 : vector<8x128xf32>
    %130 = arith.select %57, %125, %129 : vector<8x128xi1>, vector<8x128xf32>
    %131 = vector.extract_strided_slice %130 {offsets = [0, 0], sizes = [8, 32], strides = [1, 1]} : vector<8x128xf32> to vector<8x32xf32>
    %132 = vector.extract_strided_slice %130 {offsets = [0, 32], sizes = [8, 32], strides = [1, 1]} : vector<8x128xf32> to vector<8x32xf32>
    %133 = vector.extract_strided_slice %130 {offsets = [0, 64], sizes = [8, 32], strides = [1, 1]} : vector<8x128xf32> to vector<8x32xf32>
    %134 = vector.extract_strided_slice %130 {offsets = [0, 96], sizes = [8, 32], strides = [1, 1]} : vector<8x128xf32> to vector<8x32xf32>
    %135 = arith.mulf %132, %117 : vector<8x32xf32>
    %136 = arith.mulf %131, %133 : vector<8x32xf32>
    %137 = arith.addf %135, %136 : vector<8x32xf32>
    %138 = math.tanh %137 : vector<8x32xf32>
    %139 = arith.mulf %134, %138 : vector<8x32xf32>
    %cst_24 = arith.constant dense<0.000000e+00> : vector<8x128xf32>
    %140 = tpu.matmul %139, %2, %cst_24 {dimension_numbers = #tpu.dot_dimension_numbers<[1], [0], [0], [1], [0, 0, 1, 1], [], []>} : vector<8x32xf32>, vector<32x128xf32>, vector<8x128xf32> -> vector<8x128xf32>
    %141 = arith.addf %33, %140 : vector<8x128xf32>
    %cst_25 = arith.constant 5.000000e-01 : f32
    %142 = vector.broadcast %cst_25 : f32 to vector<8x128xf32>
    %143 = arith.mulf %142, %141 : vector<8x128xf32>
    %144 = arith.select %57, %141, %143 : vector<8x128xi1>, vector<8x128xf32>
    %145 = math.tanh %144 : vector<8x128xf32>
    %cst_26 = arith.constant 1.000000e+00 : f32
    %146 = vector.broadcast %cst_26 : f32 to vector<8x128xf32>
    %147 = arith.addf %145, %146 : vector<8x128xf32>
    %cst_27 = arith.constant 5.000000e-01 : f32
    %148 = vector.broadcast %cst_27 : f32 to vector<8x128xf32>
    %149 = arith.mulf %148, %147 : vector<8x128xf32>
    %150 = arith.select %57, %145, %149 : vector<8x128xi1>, vector<8x128xf32>
    %151 = vector.extract_strided_slice %150 {offsets = [0, 0], sizes = [8, 32], strides = [1, 1]} : vector<8x128xf32> to vector<8x32xf32>
    %152 = vector.extract_strided_slice %150 {offsets = [0, 32], sizes = [8, 32], strides = [1, 1]} : vector<8x128xf32> to vector<8x32xf32>
    %153 = vector.extract_strided_slice %150 {offsets = [0, 64], sizes = [8, 32], strides = [1, 1]} : vector<8x128xf32> to vector<8x32xf32>
    %154 = vector.extract_strided_slice %150 {offsets = [0, 96], sizes = [8, 32], strides = [1, 1]} : vector<8x128xf32> to vector<8x32xf32>
    %155 = arith.mulf %152, %137 : vector<8x32xf32>
    %156 = arith.mulf %151, %153 : vector<8x32xf32>
    %157 = arith.addf %155, %156 : vector<8x32xf32>
    %158 = math.tanh %157 : vector<8x32xf32>
    %159 = arith.mulf %154, %158 : vector<8x32xf32>
    %cst_28 = arith.constant dense<0.000000e+00> : vector<8x128xf32>
    %160 = tpu.matmul %159, %2, %cst_28 {dimension_numbers = #tpu.dot_dimension_numbers<[1], [0], [0], [1], [0, 0, 1, 1], [], []>} : vector<8x32xf32>, vector<32x128xf32>, vector<8x128xf32> -> vector<8x128xf32>
    %161 = arith.addf %39, %160 : vector<8x128xf32>
    %cst_29 = arith.constant 5.000000e-01 : f32
    %162 = vector.broadcast %cst_29 : f32 to vector<8x128xf32>
    %163 = arith.mulf %162, %161 : vector<8x128xf32>
    %164 = arith.select %57, %161, %163 : vector<8x128xi1>, vector<8x128xf32>
    %165 = math.tanh %164 : vector<8x128xf32>
    %cst_30 = arith.constant 1.000000e+00 : f32
    %166 = vector.broadcast %cst_30 : f32 to vector<8x128xf32>
    %167 = arith.addf %165, %166 : vector<8x128xf32>
    %cst_31 = arith.constant 5.000000e-01 : f32
    %168 = vector.broadcast %cst_31 : f32 to vector<8x128xf32>
    %169 = arith.mulf %168, %167 : vector<8x128xf32>
    %170 = arith.select %57, %165, %169 : vector<8x128xi1>, vector<8x128xf32>
    %171 = vector.extract_strided_slice %170 {offsets = [0, 0], sizes = [8, 32], strides = [1, 1]} : vector<8x128xf32> to vector<8x32xf32>
    %172 = vector.extract_strided_slice %170 {offsets = [0, 32], sizes = [8, 32], strides = [1, 1]} : vector<8x128xf32> to vector<8x32xf32>
    %173 = vector.extract_strided_slice %170 {offsets = [0, 64], sizes = [8, 32], strides = [1, 1]} : vector<8x128xf32> to vector<8x32xf32>
    %174 = vector.extract_strided_slice %170 {offsets = [0, 96], sizes = [8, 32], strides = [1, 1]} : vector<8x128xf32> to vector<8x32xf32>
    %175 = arith.mulf %172, %157 : vector<8x32xf32>
    %176 = arith.mulf %171, %173 : vector<8x32xf32>
    %177 = arith.addf %175, %176 : vector<8x32xf32>
    %178 = math.tanh %177 : vector<8x32xf32>
    %179 = arith.mulf %174, %178 : vector<8x32xf32>
    %cst_32 = arith.constant dense<0.000000e+00> : vector<8x128xf32>
    %180 = tpu.matmul %179, %2, %cst_32 {dimension_numbers = #tpu.dot_dimension_numbers<[1], [0], [0], [1], [0, 0, 1, 1], [], []>} : vector<8x32xf32>, vector<32x128xf32>, vector<8x128xf32> -> vector<8x128xf32>
    %181 = arith.addf %45, %180 : vector<8x128xf32>
    %cst_33 = arith.constant 5.000000e-01 : f32
    %182 = vector.broadcast %cst_33 : f32 to vector<8x128xf32>
    %183 = arith.mulf %182, %181 : vector<8x128xf32>
    %184 = arith.select %57, %181, %183 : vector<8x128xi1>, vector<8x128xf32>
    %185 = math.tanh %184 : vector<8x128xf32>
    %cst_34 = arith.constant 1.000000e+00 : f32
    %186 = vector.broadcast %cst_34 : f32 to vector<8x128xf32>
    %187 = arith.addf %185, %186 : vector<8x128xf32>
    %cst_35 = arith.constant 5.000000e-01 : f32
    %188 = vector.broadcast %cst_35 : f32 to vector<8x128xf32>
    %189 = arith.mulf %188, %187 : vector<8x128xf32>
    %190 = arith.select %57, %185, %189 : vector<8x128xi1>, vector<8x128xf32>
    %191 = vector.extract_strided_slice %190 {offsets = [0, 0], sizes = [8, 32], strides = [1, 1]} : vector<8x128xf32> to vector<8x32xf32>
    %192 = vector.extract_strided_slice %190 {offsets = [0, 32], sizes = [8, 32], strides = [1, 1]} : vector<8x128xf32> to vector<8x32xf32>
    %193 = vector.extract_strided_slice %190 {offsets = [0, 64], sizes = [8, 32], strides = [1, 1]} : vector<8x128xf32> to vector<8x32xf32>
    %194 = vector.extract_strided_slice %190 {offsets = [0, 96], sizes = [8, 32], strides = [1, 1]} : vector<8x128xf32> to vector<8x32xf32>
    %195 = arith.mulf %192, %177 : vector<8x32xf32>
    %196 = arith.mulf %191, %193 : vector<8x32xf32>
    %197 = arith.addf %195, %196 : vector<8x32xf32>
    %198 = math.tanh %197 : vector<8x32xf32>
    %199 = arith.mulf %194, %198 : vector<8x32xf32>
    %cst_36 = arith.constant dense<0.000000e+00> : vector<8x128xf32>
    %200 = tpu.matmul %199, %2, %cst_36 {dimension_numbers = #tpu.dot_dimension_numbers<[1], [0], [0], [1], [0, 0, 1, 1], [], []>} : vector<8x32xf32>, vector<32x128xf32>, vector<8x128xf32> -> vector<8x128xf32>
    %201 = arith.addf %51, %200 : vector<8x128xf32>
    %cst_37 = arith.constant 5.000000e-01 : f32
    %202 = vector.broadcast %cst_37 : f32 to vector<8x128xf32>
    %203 = arith.mulf %202, %201 : vector<8x128xf32>
    %204 = arith.select %57, %201, %203 : vector<8x128xi1>, vector<8x128xf32>
    %205 = math.tanh %204 : vector<8x128xf32>
    %cst_38 = arith.constant 1.000000e+00 : f32
    %206 = vector.broadcast %cst_38 : f32 to vector<8x128xf32>
    %207 = arith.addf %205, %206 : vector<8x128xf32>
    %cst_39 = arith.constant 5.000000e-01 : f32
    %208 = vector.broadcast %cst_39 : f32 to vector<8x128xf32>
    %209 = arith.mulf %208, %207 : vector<8x128xf32>
    %210 = arith.select %57, %205, %209 : vector<8x128xi1>, vector<8x128xf32>
    %211 = vector.extract_strided_slice %210 {offsets = [0, 0], sizes = [8, 32], strides = [1, 1]} : vector<8x128xf32> to vector<8x32xf32>
    %212 = vector.extract_strided_slice %210 {offsets = [0, 32], sizes = [8, 32], strides = [1, 1]} : vector<8x128xf32> to vector<8x32xf32>
    %213 = vector.extract_strided_slice %210 {offsets = [0, 64], sizes = [8, 32], strides = [1, 1]} : vector<8x128xf32> to vector<8x32xf32>
    %214 = vector.extract_strided_slice %210 {offsets = [0, 96], sizes = [8, 32], strides = [1, 1]} : vector<8x128xf32> to vector<8x32xf32>
    %215 = arith.mulf %212, %197 : vector<8x32xf32>
    %216 = arith.mulf %211, %213 : vector<8x32xf32>
    %217 = arith.addf %215, %216 : vector<8x32xf32>
    %218 = math.tanh %217 : vector<8x32xf32>
    %219 = arith.mulf %214, %218 : vector<8x32xf32>
    %c0_40 = arith.constant 0 : index
    %c0_41 = arith.constant 0 : index
    %220 = vector.load %arg5[%c0_40, %c0_41] : memref<32x128xf32, #tpu.memory_space<vmem>>, vector<32x128xf32>
    %cst_42 = arith.constant dense<0.000000e+00> : vector<8x128xf32>
    %221 = tpu.matmul %219, %220, %cst_42 {dimension_numbers = #tpu.dot_dimension_numbers<[1], [0], [0], [1], [0, 0, 1, 1], [], []>} : vector<8x32xf32>, vector<32x128xf32>, vector<8x128xf32> -> vector<8x128xf32>
    %c0_43 = arith.constant 0 : index
    %c0_44 = arith.constant 0 : index
    %222 = vector.load %arg6[%c0_43, %c0_44] : memref<1x128xf32, #tpu.memory_space<vmem>>, vector<1x128xf32>
    %223 = vector.broadcast %222 : vector<1x128xf32> to vector<8x128xf32>
    %224 = arith.addf %221, %223 : vector<8x128xf32>
    %c0_45 = arith.constant 0 : index
    %c0_46 = arith.constant 0 : index
    %225 = vector.load %arg7[%c0_45, %c0_46] : memref<8x128xf32, #tpu.memory_space<vmem>>, vector<8x128xf32>
    tpu.vector_store %arg7[%c0_45, %c0_46], %224 {strides = array<i32>} : memref<8x128xf32, #tpu.memory_space<vmem>>, vector<8x128xf32>,
    return
  }
  func.func @transform_0(%arg0: i32) -> (i32, i32) {
    %c0_i32 = arith.constant 0 : i32
    %c0_i32_0 = arith.constant 0 : i32
    return %arg0, %c0_i32 : i32, i32
  }
  func.func @transform_1(%arg0: i32) -> (i32, i32) {
    %c0_i32 = arith.constant 0 : i32
    %c0_i32_0 = arith.constant 0 : i32
    %c0_i32_1 = arith.constant 0 : i32
    return %c0_i32, %c0_i32_0 : i32, i32
  }
  func.func @transform_2(%arg0: i32) -> (i32, i32) {
    %c0_i32 = arith.constant 0 : i32
    %c0_i32_0 = arith.constant 0 : i32
    %c0_i32_1 = arith.constant 0 : i32
    return %c0_i32, %c0_i32_0 : i32, i32
  }
  func.func @transform_3(%arg0: i32) -> (i32, i32) {
    %c0_i32 = arith.constant 0 : i32
    %c0_i32_0 = arith.constant 0 : i32
    %c0_i32_1 = arith.constant 0 : i32
    return %c0_i32, %c0_i32_0 : i32, i32
  }
  func.func @transform_4(%arg0: i32) -> (i32, i32) {
    %c0_i32 = arith.constant 0 : i32
    %c0_i32_0 = arith.constant 0 : i32
    %c0_i32_1 = arith.constant 0 : i32
    return %c0_i32, %c0_i32_0 : i32, i32
  }
  func.func @transform_5(%arg0: i32) -> (i32, i32) {
    %c0_i32 = arith.constant 0 : i32
    %c0_i32_0 = arith.constant 0 : i32
    %c0_i32_1 = arith.constant 0 : i32
    return %c0_i32, %c0_i32_0 : i32, i32
  }
  func.func @transform_6(%arg0: i32) -> (i32, i32) {
    %c0_i32 = arith.constant 0 : i32
    %c0_i32_0 = arith.constant 0 : i32
    return %arg0, %c0_i32 : i32, i32
  }
}

</mosaic_0001>

<bundles_post_ra>
// kernel: tpu_custom_call.1
= control target key start
LH: loop header
LB: loop body
LE: loop exit
PB: predicated region body
PF: predicated region fallthrough
CT: control target
= control target key end

     0   :  { %11 = vsyncpa [#allocation3], 0  ;;  %s2091_s0 = inlined_call_operand.vmem [shape: f32[16,8], index: 0, kind: input, shape index: {}]   ;;  %s2092_s1 = inlined_call_operand.vmem [shape: f32[1,128], index: 1, kind: input, shape index: {}]   ;;  %s2093_s2 = inlined_call_operand.hbm [shape: f32[32,128], index: 2, kind: input, shape index: {}]   ;;  %s2094_s3 = inlined_call_operand.vmem [shape: f32[1,128], index: 3, kind: input, shape index: {}]   ;;  %s2095_s4 = inlined_call_operand.vmem [shape: f32[32,128], index: 4, kind: input, shape index: {}]   ;;  %s2096_s5 = inlined_call_operand.vmem [shape: f32[1,128], index: 5, kind: input, shape index: {}]   ;;  %s2097_s6 = inlined_call_operand.hbm [shape: f32[16,128], index: 6, kind: output, shape index: {}]  }
   0x1   :  { %12 = vsyncpa [#allocation4], 0 }
   0x2   :  { %14 = vsyncpa [#allocation4 + $0x1], 0  ;;  %s1772_s21 = smov 0   ;;  %s1774_s22 = smov 0  }
   0x3   :  { %s1776_s23 = smov 0   ;;  %s1778_s24 = smov 0  }
   0x4 LB: > { %s1793_s25 = sadd.s32 4294967295, %s1718_s24   ;;  %s1298_s26 = sadd.s32 4294967294, %s1718_s24   ;;  %s1718_s24 = sphi %s1778_s24, %s2115_s24   ;;  %s1714_s23 = sphi %s1776_s23, %s2114_s23   ;;  %s1710_s22 = sphi %s1774_s22, %s2113_s22   ;;  %s1706_s21 = sphi %s1772_s21, %s2112_s21  }
   0x5   : > { %s1797_s27 = sadd.s32 1, %s1718_s24   ;;  %s158_s28 = sadd.s32 1, %s1714_s23 }
   0x6   : > { %s155_s29 = ssub.s32 %s1718_s24, %s1797_s27  ;;  %p168_p0 = scmp.ne.s32.totalorder %s1714_s23, %s1710_s22 }
   0x7   : > { %p156_p1 = scmp.eq.s32.totalorder %s155_s29, 0  ;;  %p169_p2 = scmp.eq.s32.totalorder %s1793_s25, 1 }
   0x8   : > { %p174_p3 = scmp.ne.s32.totalorder %s1710_s22, %s1706_s21  ;;  %p175_p4 = scmp.eq.s32.totalorder %s1298_s26, 1 }
   0x9   : > { %s1808_s30 = scalar_select %p156_p1, %s1714_s23, %s158_s28  }
   0xa   : > { %p1810_p5 = por %p169_p2, %p168_p0  ;;  %p1814_p6 = por %p175_p4, %p174_p3 }
   0xb   : > { %p1299_p7 = scmp.ge.s32.totalorder %s1718_s24, 1  ;;  %p182_p8 = scmp.lt.s32.totalorder %s1718_s24, 3 }
   0xc   : > { %s2101_s7 = scalar_select %p1810_p5, 1, 0 }
   0xd   : > { %s2102_s8 = scalar_select %p1814_p6, 1, 0 }
   0xe   : > { %p2098_p9 = scmp.eq.s32.totalorder %s1793_s25, 0  ;;  %p1821_p10 = pnand %p1299_p7, %p182_p8 }
   0xf   : > { %s1720_s10 = smov [#allocation2]   ;;  %s1624_s15 = scalar_lea.hbm %s2093_s2, 512 }
  0x10   : > { %s2103_s9 = scalar_select %p1821_p10, 1, 0 }
  0x11   : > { %s197_s11 = sshll.u32 %s1720_s10, 4  ;;  %p1525_p11 = pneg %p1821_p10  ;;  %s198_s11 = int_to_ptr.vmem [resolvable:$true] %s197_s11 }
  0x12   : > { %p1625_p13 = scmp.ne.s32.totalorder %s2093_s2, %s1624_s15  ;;  %p1631_p3 = scmp.lt.u32.totalorder %s1624_s15, %s2093_s2 }
  0x13   : > { %p1829_p12 = pnand %p2098_p9, %p1525_p11 }
  0x15   : > { %p1626_p0 = pneg %p1829_p12 }
  0x17   : > { %p1627_p1 = pnand %p1626_p0, %p1625_p13 }
  0x19   : > { %p1628_p2 = pneg %p1627_p1 }
  0x1b   : > { %p1633_p4 = pnand %p1631_p3, %p1628_p2 }
  0x1d   : > { %1636 = shalt.err (!%p1633_p4)
}
  0x1e   : > { %s1637_s20 = scalar_lea.vmem %s198_s11, 512  ;;  %p1645_p9 = scmp.lt.s32.totalorder %s198_s11, %s198_s11 }
  0x1f   : > { %p1638_p7 = scmp.ne.s32.totalorder %s198_s11, %s1637_s20  ;;  %p1646_p6 = scmp.lt.s32.totalorder %s1637_s20, %s1637_s20 }
  0x21   : > { %p1640_p8 = pnand %p1638_p7, %p1626_p0  ;;  %p1647_p5 = por %p1646_p6, %p1645_p9 }
  0x23   : > { %p1641_p11 = pneg %p1640_p8 }
  0x25   : > { %p1648_p10 = pnand %p1647_p5, %p1641_p11 }
  0x27   : > { %1651 = shalt.err (!%p1648_p10)
}
  0x28   : > { %s1721_s26 = smov 128   ;;  %s1722_s28 = smov 8  }
  0x29   : > { %1528 = dma.hbm_to_vmem [thread:$0]  (!%p1829_p12), %s2093_s2, 512, %s198_s11, [#allocation3], %s1721_s26, %s1721_s26, %s1722_s28  }
  0x2a   : > { %p2105_p13 = scmp.ne.s32.totalorder %s2103_s9, 0 }
  0x2b   : > { %p2106_p1 = scmp.eq.s32.totalorder (!%p2105_p13), %s1793_s25, 0 }
  0x2c   : > { %229 = sbr.rel (%p2105_p13) target bundleno = 5971 (0x1753), region = 44 }
  0x33   : > { %1697 = dma.done.wait (%p2106_p1), [#allocation3], 512   ;;  %p2107_p0 = pmov %p2106_p1 }
  0x34   : > { %v1723_v0 = vmov 0.0|0.0   ;;  %vm1724_vm0 = vmmov 0   ;;  %v1725_v1 = vmov 0.0   ;;  %p258_p5 = scmp.lt.s32.totalorder %s1793_s25, 1  ;;  %v1726_v2 = vmov 0   ;;  %v264_v3 = vld [vmem:[#allocation2] sm:$0xff] }
  0x35   : > { %1699 = vsyncadd (%p2107_p0), [#allocation3], 4294966784  ;;  %1465 = vmatprep.subr.bf16.mxu0 %v1723_v0  ;;  %1374 = vmatprep.mubr.msk.f32.mxu0 %vm1724_vm0, %v1725_v1  ;;  %v265_v4 = vld [vmem:[#allocation2 + $0x8] sm:$0xff]  ;;  %v266_v5 = vld [vmem:[#allocation2 + $0x10] sm:$0xff]  ;;  %v330_v12 = vlaneseq  ;;  %s1727_s19 = smov 64   ;;  %s1728_s20 = smov 32  }
  0x36   : > { %1584 = vset.pattern.permute.xlu0 %v1726_v2  ;;  %1471 = vmatprep.subr.bf16.mxu1 %v1723_v0  ;;  %s259_s9 = scalar_select %p258_p5, %s1793_s25, 1  ;;  %v1866_v6 = vpack.c.bf16 %v265_v4, %v264_v3  ;;  %v267_v7 = vld [vmem:[#allocation2 + $0x18] sm:$0xff]  ;;  %v1891_v10 = vld [vmem:[%s2092_s1] ss:$0 sm:$0xff]  ;;  %v1729_v33 = vmov 1   ;;  %vm335_vm4 = vcmask 261120  }
  0x37   : > { %1385 = vmatprep.mubr.msk.f32.mxu1 %vm1724_vm0, %v1725_v1  ;;  %v1872_v9 = vpack.c.bf16 %v267_v7, %v266_v5  ;;  %v1897_v14 = vld [vmem:[%s2094_s3] ss:$0 sm:$0xff]  ;;  %v331_v15 = vand.u32 127, %v330_v12  ;;  %1585 = vset.pattern.permute.xlu1 %v1729_v33  ;;  %v1730_v55 = vmov 2   ;;  %v1127_v20 = vld [vmem:[%s2095_s4 + $0x8] sm:$0xff]  ;;  %s1318_s18 = sshll.u32 %s1793_s25, 7 }
  0x38   : > { %s1305_s11 = sshll.u32 %s259_s9, 3  ;;  %1467 = vmatpush3.bf16.msra.mxu0 %v1866_v6  ;;  %1473 = vmatpush3.bf16.msra.mxu1 %v1866_v6  ;;  %p2110_p9 = scmp.ne.s32.totalorder %s2101_s7, 0 }
  0x39   : > { %s261_s14 = scalar_lea.vmem %s2091_s0, %s1305_s11  ;;  %1468 = vmatprep.subr.bf16.mxu0 %v1723_v0  ;;  %1474 = vmatprep.subr.bf16.mxu1 %v1723_v0  ;;  %vm332_vm1 = vcmp.ge.s32.totalorder %v331_v15, 64  ;;  %vm333_vm2 = vcmp.lt.s32.totalorder %v331_v15, 96  ;;  %s1736_s25 = smov [#allocation5]  }
  0x3a   : > { %v1868_v8 = vld [vmem:[%s261_s14] sm:$0xff]  ;;  %vm1900_vm3 = vmand %vm332_vm1, %vm333_vm2  ;;  %s255_s14 = sand.u32 1, %s1710_s22   ;;  %s1656_s11 = sshll.u32 %s1736_s25, 4  ;;  %s1657_s11 = int_to_ptr.vmem [resolvable:$false] %s1656_s11 }
  0x3b   : > { %271 = vperm.xlu0 %1584, %v1868_v8   ;;  %s1304_s15 = sshll.u32 %s255_s14, 3  ;;  %s1214_s10 = scalar_lea.sflag [#allocation4], %s255_s14 }
  0x3c   : > { %1470 = vmatpush3.bf16.msra.mxu0 %v1872_v9  ;;  %1476 = vmatpush3.bf16.msra.mxu1 %v1872_v9  ;;  %s257_s26 = scalar_lea.vmem [#allocation5], %s1304_s15  ;;  %s1658_s12 = scalar_lea.vmem %s1657_s11, 256 }
  0x3d   : > { %1477 = vmatprep.subr.bf16.mxu0 %v1723_v0  ;;  %1483 = vmatprep.subr.bf16.mxu1 %v1723_v0  ;;  %s1227_s28 = sshll.u32 %s257_s26, 4  ;;  %s2051_s28 = int_to_ptr.vmem [resolvable:$true] %s1227_s28 }
  0x3e   : > { %s1652_s9 = scalar_lea.vmem %s2051_s28, 128  ;;  %p1659_p2 = scmp.lt.s32.totalorder %s2051_s28, %s1657_s11 }
  0x3f   : > { %1375 = vmatmul.mubr.f32.vlgmr.msra.gmra.mrb[0].mxu0 %v1725_v1  ;;  %1586 = vset.pattern.permute.xlu0 %v1730_v55  ;;  %p1653_p6 = scmp.ne.s32.totalorder %s2051_s28, %s1652_s9  ;;  %p1660_p3 = scmp.lt.s32.totalorder %s1658_s12, %s1652_s9 }
  0x40   : > { %1479 = vmatpush3.bf16.msra.mxu0 %v1866_v6  ;;  %1396 = vmatprep.mubr.msk.f32.mxu0 %vm1724_vm0, %v1725_v1 }
  0x41   : > { %1480 = vmatprep.subr.bf16.mxu0 %v1723_v0  ;;  %p1654_p10 = pnand %p1653_p6, %p2110_p9  ;;  %p1661_p4 = por %p1660_p3, %p1659_p2 }
  0x43   : > { %p1655_p12 = pneg %p1654_p10 }
  0x44   : > { %1482 = vmatpush3.bf16.msra.mxu0 %v1872_v9 }
  0x45   : > { %1489 = vmatprep.subr.bf16.mxu0 %v1723_v0  ;;  %p1662_p7 = pnand %p1661_p4, %p1655_p12 }
  0xba   : > { %v272_v11 = vpop.permute.xlu0 %271 }
  0xbb   : > { %v280_v13 = vmul.f32 %v1891_v10, %v272_v11 }
  0xbd   : > { %v287_v16 = vadd.f32 %v1897_v14, %v280_v13 }
 0x112   : > { %v405_v17 = vpop.f32.mrb[0].mxu0 }
 0x113   : > { %v409_v18 = vadd.f32 %v405_v17, %v287_v16  ;;  %v1376_v19 = vpop.f32.mrb[1].mxu0 }
 0x115   : > { %v410_v21 = vmul.f32 0.5, %v409_v18 }
 0x117   : > { %v411_v22 = vsel %vm1900_vm3, %v409_v18, %v410_v21  ;;  %v1731_v21 = vmov 3  }
 0x118   : > { %1592 = vtanh.f32 %v411_v22 }
 0x122   : > { %v1593_v23 = vpop.eup %1592 }
 0x123   : > { %v413_v24 = vadd.f32 1.0, %v1593_v23 }
 0x125   : > { %v414_v25 = vmul.f32 0.5, %v413_v24 }
 0x127   : > { %v415_v26 = vsel %vm1900_vm3, %v1593_v23, %v414_v25 }
 0x128   : > { %418 = vrot.lane.b32.xlu0 %v415_v26, %s1727_s19  ;;  %v416_v29 = vmul.f32 0.0, %v415_v26 }
 0x19a   : > { %v419_v27 = vpop.permute.xlu0 %418 }
 0x19b   : > { %v421_v28 = vmul.f32 %v419_v27, %v415_v26 }
 0x19d   : > { %423 = vrot.lane.b32.xlu1 %v421_v28, %s1728_s20 }
 0x20f   : > { %v424_v30 = vpop.permute.xlu1 %423 }
 0x210   : > { %v426_v31 = vadd.f32 %v424_v30, %v416_v29 }
 0x212   : > { %1594 = vtanh.f32 %v426_v31 }
 0x21c   : > { %v1595_v32 = vpop.eup %1594 }
 0x21d   : > { %429 = vrot.lane.b32.xlu1 %v1595_v32, %s1727_s19 }
 0x221   : > { %289 = vperm.xlu1 %1585, %v1868_v8  }
 0x28f   : > { %v430_v34 = vpop.permute.xlu1 %429 }
 0x290   : > { %v432_v35 = vmul.f32 %v430_v34, %v415_v26 }
 0x292   : > { %434 = vrot.lane.b32.xlu0 %v432_v35, %s1728_s20 }
 0x2a0   : > { %v290_v37 = vpop.permute.xlu1 %289 }
 0x2a1   : > { %v292_v38 = vmul.f32 %v1891_v10, %v290_v37 }
 0x2a3   : > { %v293_v39 = vadd.f32 %v1897_v14, %v292_v38 }
 0x304   : > { %v435_v36 = vpop.permute.xlu0 %434 }
 0x305   : > { %1386 = vmatmul.mubr.msk.f32.vlgmr.msra.gmra.mrb[0].mxu1 %vm335_vm4, %v435_v36 }
 0x306   : > { %1485 = vmatpush3.bf16.msra.mxu1 %v1866_v6  ;;  %1407 = vmatprep.mubr.msk.f32.mxu1 %vm1724_vm0, %v1725_v1 }
 0x307   : > { %1486 = vmatprep.subr.bf16.mxu1 %v1723_v0 }
 0x30a   : > { %1488 = vmatpush3.bf16.msra.mxu1 %v1872_v9 }
 0x30b   : > { %1495 = vmatprep.subr.bf16.mxu1 %v1723_v0 }
 0x3d8   : > { %v504_v40 = vpop.f32.mrb[0].mxu1 }
 0x3d9   : > { %v508_v41 = vadd.f32 %v504_v40, %v293_v39  ;;  %v1387_v42 = vpop.f32.mrb[1].mxu1 }
 0x3db   : > { %v509_v43 = vmul.f32 0.5, %v508_v41 }
 0x3dd   : > { %v510_v44 = vsel %vm1900_vm3, %v508_v41, %v509_v43  ;;  %v1732_v43 = vmov 4  }
 0x3de   : > { %1596 = vtanh.f32 %v510_v44 }
 0x3e8   : > { %v1597_v45 = vpop.eup %1596 }
 0x3e9   : > { %v512_v46 = vadd.f32 1.0, %v1597_v45 }
 0x3eb   : > { %v513_v47 = vmul.f32 0.5, %v512_v46 }
 0x3ed   : > { %v514_v48 = vsel %vm1900_vm3, %v1597_v45, %v513_v47 }
 0x3ee   : > { %517 = vrot.lane.b32.xlu0 %v514_v48, %s1727_s19  ;;  %v515_v51 = vmul.f32 %v514_v48, %v426_v31 }
 0x460   : > { %v518_v49 = vpop.permute.xlu0 %517 }
 0x461   : > { %v520_v50 = vmul.f32 %v518_v49, %v514_v48 }
 0x463   : > { %522 = vrot.lane.b32.xlu1 %v520_v50, %s1728_s20 }
 0x4d5   : > { %v523_v52 = vpop.permute.xlu1 %522 }
 0x4d6   : > { %v525_v53 = vadd.f32 %v523_v52, %v515_v51 }
 0x4d8   : > { %1598 = vtanh.f32 %v525_v53 }
 0x4e2   : > { %v1599_v54 = vpop.eup %1598 }
 0x4e3   : > { %528 = vrot.lane.b32.xlu0 %v1599_v54, %s1727_s19 }
 0x4e7   : > { %295 = vperm.xlu0 %1586, %v1868_v8  }
 0x4eb   : > { %1587 = vset.pattern.permute.xlu0 %v1731_v21 }
 0x555   : > { %v529_v56 = vpop.permute.xlu0 %528 }
 0x556   : > { %v531_v57 = vmul.f32 %v529_v56, %v514_v48 }
 0x558   : > { %533 = vrot.lane.b32.xlu1 %v531_v57, %s1728_s20 }
 0x566   : > { %v296_v59 = vpop.permute.xlu0 %295 }
 0x567   : > { %v298_v60 = vmul.f32 %v1891_v10, %v296_v59 }
 0x569   : > { %v299_v61 = vadd.f32 %v1897_v14, %v298_v60 }
 0x5ca   : > { %v534_v58 = vpop.permute.xlu1 %533 }
 0x5cb   : > { %1397 = vmatmul.mubr.msk.f32.vlgmr.msra.gmra.mrb[2].mxu0 %vm335_vm4, %v534_v58 }
 0x5cc   : > { %1491 = vmatpush3.bf16.msra.mxu0 %v1866_v6  ;;  %1418 = vmatprep.mubr.msk.f32.mxu0 %vm1724_vm0, %v1725_v1 }
 0x5cd   : > { %1492 = vmatprep.subr.bf16.mxu0 %v1723_v0 }
 0x5d0   : > { %1494 = vmatpush3.bf16.msra.mxu0 %v1872_v9 }
 0x5d1   : > { %1501 = vmatprep.subr.bf16.mxu0 %v1723_v0 }
 0x69e   : > { %v603_v62 = vpop.f32.mrb[2].mxu0 }
 0x69f   : > { %v607_v63 = vadd.f32 %v603_v62, %v299_v61  ;;  %v1398_v2 = vpop.f32.mrb[3].mxu0 }
 0x6a1   : > { %v608_v3 = vmul.f32 0.5, %v607_v63 }
 0x6a3   : > { %v609_v4 = vsel %vm1900_vm3, %v607_v63, %v608_v3  ;;  %v1733_v3 = vmov 5  }
 0x6a4   : > { %1600 = vtanh.f32 %v609_v4 }
 0x6ae   : > { %v1601_v5 = vpop.eup %1600 }
 0x6af   : > { %v611_v7 = vadd.f32 1.0, %v1601_v5 }
 0x6b1   : > { %v612_v11 = vmul.f32 0.5, %v611_v7 }
 0x6b3   : > { %v613_v12 = vsel %vm1900_vm3, %v1601_v5, %v612_v11 }
 0x6b4   : > { %616 = vrot.lane.b32.xlu1 %v613_v12, %s1727_s19  ;;  %v614_v16 = vmul.f32 %v613_v12, %v525_v53 }
 0x726   : > { %v617_v13 = vpop.permute.xlu1 %616 }
 0x727   : > { %v619_v15 = vmul.f32 %v617_v13, %v613_v12 }
 0x729   : > { %621 = vrot.lane.b32.xlu1 %v619_v15, %s1728_s20 }
 0x79b   : > { %v622_v17 = vpop.permute.xlu1 %621 }
 0x79c   : > { %v624_v18 = vadd.f32 %v622_v17, %v614_v16 }
 0x79e   : > { %1602 = vtanh.f32 %v624_v18 }
 0x7a8   : > { %v1603_v19 = vpop.eup %1602 }
 0x7a9   : > { %627 = vrot.lane.b32.xlu0 %v1603_v19, %s1727_s19 }
 0x7ad   : > { %301 = vperm.xlu0 %1587, %v1868_v8  }
 0x7b1   : > { %1588 = vset.pattern.permute.xlu0 %v1732_v43 }
 0x81b   : > { %v628_v22 = vpop.permute.xlu0 %627 }
 0x81c   : > { %v630_v23 = vmul.f32 %v628_v22, %v613_v12 }
 0x81e   : > { %632 = vrot.lane.b32.xlu1 %v630_v23, %s1728_s20 }
 0x82c   : > { %v302_v25 = vpop.permute.xlu0 %301 }
 0x82d   : > { %v304_v26 = vmul.f32 %v1891_v10, %v302_v25 }
 0x82f   : > { %v305_v27 = vadd.f32 %v1897_v14, %v304_v26 }
 0x890   : > { %v633_v24 = vpop.permute.xlu1 %632 }
 0x891   : > { %1408 = vmatmul.mubr.msk.f32.vlgmr.msra.gmra.mrb[2].mxu1 %vm335_vm4, %v633_v24 }
 0x892   : > { %1497 = vmatpush3.bf16.msra.mxu1 %v1866_v6  ;;  %1429 = vmatprep.mubr.msk.f32.mxu1 %vm1724_vm0, %v1725_v1 }
 0x893   : > { %1498 = vmatprep.subr.bf16.mxu1 %v1723_v0 }
 0x896   : > { %1500 = vmatpush3.bf16.msra.mxu1 %v1872_v9 }
 0x897   : > { %1507 = vmatprep.subr.bf16.mxu1 %v1723_v0 }
 0x964   : > { %v702_v28 = vpop.f32.mrb[2].mxu1 }
 0x965   : > { %v706_v29 = vadd.f32 %v702_v28, %v305_v27  ;;  %v1409_v30 = vpop.f32.mrb[3].mxu1 }
 0x967   : > { %v707_v31 = vmul.f32 0.5, %v706_v29 }
 0x969   : > { %v708_v32 = vsel %vm1900_vm3, %v706_v29, %v707_v31  ;;  %v1734_v29 = vmov 6  }
 0x96a   : > { %1604 = vtanh.f32 %v708_v32 }
 0x974   : > { %v1605_v33 = vpop.eup %1604 }
 0x975   : > { %v710_v34 = vadd.f32 1.0, %v1605_v33 }
 0x977   : > { %v711_v35 = vmul.f32 0.5, %v710_v34 }
 0x979   : > { %v712_v36 = vsel %vm1900_vm3, %v1605_v33, %v711_v35 }
 0x97a   : > { %715 = vrot.lane.b32.xlu1 %v712_v36, %s1727_s19  ;;  %v713_v39 = vmul.f32 %v712_v36, %v624_v18 }
 0x9ec   : > { %v716_v37 = vpop.permute.xlu1 %715 }
 0x9ed   : > { %v718_v38 = vmul.f32 %v716_v37, %v712_v36 }
 0x9ef   : > { %720 = vrot.lane.b32.xlu1 %v718_v38, %s1728_s20 }
 0xa61   : > { %v721_v40 = vpop.permute.xlu1 %720 }
 0xa62   : > { %v723_v41 = vadd.f32 %v721_v40, %v713_v39 }
 0xa64   : > { %1606 = vtanh.f32 %v723_v41 }
 0xa6e   : > { %v1607_v42 = vpop.eup %1606 }
 0xa6f   : > { %726 = vrot.lane.b32.xlu0 %v1607_v42, %s1727_s19 }
 0xa73   : > { %307 = vperm.xlu0 %1588, %v1868_v8  }
 0xa77   : > { %1589 = vset.pattern.permute.xlu0 %v1733_v3 }
 0xae1   : > { %v727_v44 = vpop.permute.xlu0 %726 }
 0xae2   : > { %v729_v45 = vmul.f32 %v727_v44, %v712_v36 }
 0xae4   : > { %731 = vrot.lane.b32.xlu1 %v729_v45, %s1728_s20 }
 0xaf2   : > { %v308_v47 = vpop.permute.xlu0 %307 }
 0xaf3   : > { %v310_v48 = vmul.f32 %v1891_v10, %v308_v47 }
 0xaf5   : > { %v311_v49 = vadd.f32 %v1897_v14, %v310_v48 }
 0xb56   : > { %v732_v46 = vpop.permute.xlu1 %731 }
 0xb57   : > { %1419 = vmatmul.mubr.msk.f32.vlgmr.msra.gmra.mrb[4].mxu0 %vm335_vm4, %v732_v46 }
 0xb58   : > { %1503 = vmatpush3.bf16.msra.mxu0 %v1866_v6  ;;  %1440 = vmatprep.mubr.msk.f32.mxu0 %vm1724_vm0, %v1725_v1 }
 0xb59   : > { %1504 = vmatprep.subr.bf16.mxu0 %v1723_v0 }
 0xb5c   : > { %1506 = vmatpush3.bf16.msra.mxu0 %v1872_v9 }
 0xb5d   : > { %1513 = vmatprep.subr.bf16.mxu0 %v1723_v0 }
 0xc2a   : > { %v801_v50 = vpop.f32.mrb[4].mxu0 }
 0xc2b   : > { %v805_v51 = vadd.f32 %v801_v50, %v311_v49  ;;  %v1420_v52 = vpop.f32.mrb[5].mxu0  ;;  %v1735_v50 = vmov 7  }
 0xc2d   : > { %v806_v53 = vmul.f32 0.5, %v805_v51 }
 0xc2f   : > { %v807_v54 = vsel %vm1900_vm3, %v805_v51, %v806_v53 }
 0xc30   : > { %1608 = vtanh.f32 %v807_v54 }
 0xc3a   : > { %v1609_v55 = vpop.eup %1608 }
 0xc3b   : > { %v809_v56 = vadd.f32 1.0, %v1609_v55 }
 0xc3d   : > { %v810_v57 = vmul.f32 0.5, %v809_v56 }
 0xc3f   : > { %v811_v58 = vsel %vm1900_vm3, %v1609_v55, %v810_v57 }
 0xc40   : > { %814 = vrot.lane.b32.xlu1 %v811_v58, %s1727_s19  ;;  %v812_v61 = vmul.f32 %v811_v58, %v723_v41 }
 0xcb2   : > { %v815_v59 = vpop.permute.xlu1 %814 }
 0xcb3   : > { %v817_v60 = vmul.f32 %v815_v59, %v811_v58 }
 0xcb5   : > { %819 = vrot.lane.b32.xlu1 %v817_v60, %s1728_s20 }
 0xd27   : > { %v820_v62 = vpop.permute.xlu1 %819 }
 0xd28   : > { %v822_v63 = vadd.f32 %v820_v62, %v812_v61 }
 0xd2a   : > { %1610 = vtanh.f32 %v822_v63 }
 0xd34   : > { %v1611_v2 = vpop.eup %1610 }
 0xd35   : > { %825 = vrot.lane.b32.xlu0 %v1611_v2, %s1727_s19 }
 0xd39   : > { %313 = vperm.xlu0 %1589, %v1868_v8  }
 0xd3d   : > { %1590 = vset.pattern.permute.xlu0 %v1734_v29 }
 0xda7   : > { %v826_v4 = vpop.permute.xlu0 %825 }
 0xda8   : > { %v828_v5 = vmul.f32 %v826_v4, %v811_v58 }
 0xdaa   : > { %830 = vrot.lane.b32.xlu1 %v828_v5, %s1728_s20 }
 0xdb8   : > { %v314_v11 = vpop.permute.xlu0 %313 }
 0xdb9   : > { %v316_v12 = vmul.f32 %v1891_v10, %v314_v11  ;;  %v1128_v11 = vld [vmem:[%s2095_s4 + $0x10] sm:$0xff] }
 0xdbb   : > { %v317_v13 = vadd.f32 %v1897_v14, %v316_v12 }
 0xe1c   : > { %v831_v7 = vpop.permute.xlu1 %830 }
 0xe1d   : > { %1430 = vmatmul.mubr.msk.f32.vlgmr.msra.gmra.mrb[4].mxu1 %vm335_vm4, %v831_v7  ;;  %v1126_v7 = vld [vmem:[%s2095_s4] sm:$0xff] }
 0xe1e   : > { %1509 = vmatpush3.bf16.msra.mxu1 %v1866_v6  ;;  %1451 = vmatprep.mubr.msk.f32.mxu1 %vm1724_vm0, %v1725_v1  ;;  %v1514_v12 = vpack.c.bf16 %v1127_v20, %v1126_v7 }
 0xe1f   : > { %1510 = vmatprep.subr.bf16.mxu1 %v1723_v0 }
 0xe22   : > { %1512 = vmatpush3.bf16.msra.mxu1 %v1872_v9 }
 0xef0   : > { %v900_v15 = vpop.f32.mrb[4].mxu1 }
 0xef1   : > { %v904_v16 = vadd.f32 %v900_v15, %v317_v13  ;;  %v1431_v17 = vpop.f32.mrb[5].mxu1  ;;  %v1129_v13 = vld [vmem:[%s2095_s4 + $0x18] sm:$0xff] }
 0xef2   : > { %v1517_v15 = vpack.c.bf16 %v1129_v13, %v1128_v11 }
 0xef3   : > { %v905_v18 = vmul.f32 0.5, %v904_v16 }
 0xef5   : > { %v906_v19 = vsel %vm1900_vm3, %v904_v16, %v905_v18 }
 0xef6   : > { %1612 = vtanh.f32 %v906_v19 }
 0xf00   : > { %v1613_v6 = vpop.eup %1612 }
 0xf01   : > { %v908_v21 = vadd.f32 1.0, %v1613_v6 }
 0xf03   : > { %v909_v22 = vmul.f32 0.5, %v908_v21 }
 0xf05   : > { %v910_v23 = vsel %vm1900_vm3, %v1613_v6, %v909_v22  ;;  %v1315_v6 = vld [vmem:[%s2096_s5] ss:$0 sm:$0xff] }
 0xf06   : > { %913 = vrot.lane.b32.xlu1 %v910_v23, %s1727_s19  ;;  %v911_v25 = vmul.f32 %v910_v23, %v822_v63 }
 0xf78   : > { %v914_v9 = vpop.permute.xlu1 %913 }
 0xf79   : > { %v916_v24 = vmul.f32 %v914_v9, %v910_v23 }
 0xf7b   : > { %918 = vrot.lane.b32.xlu1 %v916_v24, %s1728_s20 }
 0xfed   : > { %v919_v26 = vpop.permute.xlu1 %918 }
 0xfee   : > { %v921_v27 = vadd.f32 %v919_v26, %v911_v25 }
 0xff0   : > { %1614 = vtanh.f32 %v921_v27 }
 0xffa   : > { %v1615_v28 = vpop.eup %1614 }
 0xffb   : > { %924 = vrot.lane.b32.xlu0 %v1615_v28, %s1727_s19 }
 0xfff   : > { %319 = vperm.xlu0 %1590, %v1868_v8  }
0x1003   : > { %1591 = vset.pattern.permute.xlu0 %v1735_v50 }
0x106d   : > { %v925_v30 = vpop.permute.xlu0 %924 }
0x106e   : > { %v927_v31 = vmul.f32 %v925_v30, %v910_v23 }
0x1070   : > { %929 = vrot.lane.b32.xlu1 %v927_v31, %s1728_s20 }
0x107e   : > { %v320_v33 = vpop.permute.xlu0 %319 }
0x107f   : > { %v322_v34 = vmul.f32 %v1891_v10, %v320_v33 }
0x1081   : > { %v323_v35 = vadd.f32 %v1897_v14, %v322_v34 }
0x10e2   : > { %v930_v32 = vpop.permute.xlu1 %929 }
0x10e3   : > { %1441 = vmatmul.mubr.msk.f32.vlgmr.msra.gmra.mrb[6].mxu0 %vm335_vm4, %v930_v32 }
0x10e4   : > { %1462 = vmatprep.mubr.msk.f32.mxu0 %vm1724_vm0, %v1725_v1  ;;  %1515 = vmatpush3.bf16.msra.mxu0 %v1514_v12 }
0x10e5   : > { %1516 = vmatprep.subr.bf16.mxu0 %v1723_v0 }
0x10e8   : > { %1518 = vmatpush3.bf16.msra.mxu0 %v1517_v15 }
0x11b6   : > { %v999_v36 = vpop.f32.mrb[6].mxu0 }
0x11b7   : > { %v1003_v37 = vadd.f32 %v999_v36, %v323_v35  ;;  %v1442_v38 = vpop.f32.mrb[7].mxu0 }
0x11b9   : > { %v1004_v39 = vmul.f32 0.5, %v1003_v37 }
0x11bb   : > { %v1005_v40 = vsel %vm1900_vm3, %v1003_v37, %v1004_v39 }
0x11bc   : > { %1616 = vtanh.f32 %v1005_v40 }
0x11c6   : > { %v1617_v41 = vpop.eup %1616 }
0x11c7   : > { %v1007_v42 = vadd.f32 1.0, %v1617_v41 }
0x11c9   : > { %v1008_v43 = vmul.f32 0.5, %v1007_v42 }
0x11cb   : > { %v1009_v44 = vsel %vm1900_vm3, %v1617_v41, %v1008_v43 }
0x11cc   : > { %1012 = vrot.lane.b32.xlu1 %v1009_v44, %s1727_s19  ;;  %v1010_v46 = vmul.f32 %v1009_v44, %v921_v27 }
0x123e   : > { %v1013_v1 = vpop.permute.xlu1 %1012 }
0x123f   : > { %v1015_v45 = vmul.f32 %v1013_v1, %v1009_v44 }
0x1241   : > { %1017 = vrot.lane.b32.xlu1 %v1015_v45, %s1728_s20 }
0x12b3   : > { %v1018_v47 = vpop.permute.xlu1 %1017 }
0x12b4   : > { %v1020_v48 = vadd.f32 %v1018_v47, %v1010_v46 }
0x12b6   : > { %1618 = vtanh.f32 %v1020_v48 }
0x12c0   : > { %v1619_v49 = vpop.eup %1618 }
0x12c1   : > { %1023 = vrot.lane.b32.xlu0 %v1619_v49, %s1727_s19 }
0x12c5   : > { %325 = vperm.xlu0 %1591, %v1868_v8  }
0x1333   : > { %v1024_v51 = vpop.permute.xlu0 %1023 }
0x1334   : > { %v1026_v52 = vmul.f32 %v1024_v51, %v1009_v44 }
0x1336   : > { %1028 = vrot.lane.b32.xlu1 %v1026_v52, %s1728_s20 }
0x1344   : > { %v326_v54 = vpop.permute.xlu0 %325 }
0x1345   : > { %v328_v55 = vmul.f32 %v1891_v10, %v326_v54 }
0x1347   : > { %v329_v56 = vadd.f32 %v1897_v14, %v328_v55 }
0x13a8   : > { %v1029_v53 = vpop.permute.xlu1 %1028 }
0x13a9   : > { %1452 = vmatmul.mubr.msk.f32.vlgmr.msra.gmra.mrb[6].mxu1 %vm335_vm4, %v1029_v53 }
0x147c   : > { %v1098_v57 = vpop.f32.mrb[6].mxu1 }
0x147d   : > { %v1102_v58 = vadd.f32 %v1098_v57, %v329_v56  ;;  %v1453_v59 = vpop.f32.mrb[7].mxu1 }
0x147f   : > { %v1103_v60 = vmul.f32 0.5, %v1102_v58 }
0x1481   : > { %v1104_v61 = vsel %vm1900_vm3, %v1102_v58, %v1103_v60 }
0x1482   : > { %1620 = vtanh.f32 %v1104_v61 }
0x148c   : > { %v1621_v8 = vpop.eup %1620 }
0x148d   : > { %v1106_v62 = vadd.f32 1.0, %v1621_v8 }
0x148f   : > { %v1107_v63 = vmul.f32 0.5, %v1106_v62 }
0x1491   : > { %v1108_v2 = vsel %vm1900_vm3, %v1621_v8, %v1107_v63 }
0x1492   : > { %1111 = vrot.lane.b32.xlu1 %v1108_v2, %s1727_s19  ;;  %v1109_v14 = vmul.f32 %v1108_v2, %v1020_v48 }
0x1504   : > { %v1112_v3 = vpop.permute.xlu1 %1111 }
0x1505   : > { %v1114_v10 = vmul.f32 %v1112_v3, %v1108_v2 }
0x1507   : > { %1116 = vrot.lane.b32.xlu1 %v1114_v10, %s1728_s20 }
0x1579   : > { %v1117_v4 = vpop.permute.xlu1 %1116 }
0x157a   : > { %v1119_v5 = vadd.f32 %v1117_v4, %v1109_v14 }
0x157c   : > { %1622 = vtanh.f32 %v1119_v5 }
0x1586   : > { %v1623_v16 = vpop.eup %1622 }
0x1587   : > { %1122 = vrot.lane.b32.xlu0 %v1623_v16, %s1727_s19 }
0x15f9   : > { %v1123_v17 = vpop.permute.xlu0 %1122 }
0x15fa   : > { %v1125_v18 = vmul.f32 %v1123_v17, %v1108_v2 }
0x15fc   : > { %1138 = vrot.lane.b32.xlu1 %v1125_v18, %s1728_s20  ;;  %s2049_s20 = scalar_lea.hbm %s2097_s6, %s1318_s18 }
0x166e   : > { %v1139_v19 = vpop.permute.xlu1 %1138 }
0x166f   : > { %1463 = vmatmul.mubr.msk.f32.vlgmr.msra.gmra.mrb[8].mxu0 %vm335_vm4, %v1139_v19 }
0x1742   : > { %v1208_v0 = vpop.f32.mrb[8].mxu0 }
0x1743   : > { %v1209_v21 = vadd.f32 %v1315_v6, %v1208_v0  ;;  %v1464_v22 = vpop.f32.mrb[9].mxu0 }
0x1745   : > { %1212 = vst [vmem:[%s257_s26] sm:$0xff] %v1209_v21 }
0x1746   : > { %1665 = shalt.err (!%p1662_p7)
}
0x1747   : > { %s1666_s13 = scalar_lea.hbm %s2049_s20, 128  ;;  %s1670_s16 = scalar_lea.hbm %s2097_s6, 256 }
0x1748   : > { %p1667_p8 = scmp.ne.s32.totalorder %s2049_s20, %s1666_s13  ;;  %p1671_p1 = scmp.lt.u32.totalorder %s2049_s20, %s2097_s6 }
0x1749   : > { %p1672_p0 = scmp.lt.u32.totalorder %s1670_s16, %s1666_s13  ;;  %p1674_p6 = scmp.lt.u32.totalorder %s1666_s13, %s2049_s20 }
0x174a   : > { %p1668_p11 = pnand %p1667_p8, %p2110_p9 }
0x174b   : > { %p1673_p5 = por %p1672_p0, %p1671_p1 }
0x174c   : > { %p1669_p13 = pneg %p1668_p11 }
0x174d   : > { %p1675_p10 = por %p1674_p6, %p1673_p5 }
0x174f   : > { %p1676_p12 = pnand %p1675_p10, %p1669_p13 }
0x1751   : > { %1679 = shalt.err (!%p1676_p12)
}
0x1752   : > { %1523 = dma.vmem_to_hbm [thread:$0]  (%p2110_p9), %s2051_s28, 128, %s2049_s20, %s1214_s10  }
0x1753 PF: > { %p1535_p2 = scmp.ge.s32.totalorder %s1718_s24, 2  ;;  %s1239_s26 = sand.u32 1, %s1706_s21  }
0x1754   : > { %p2111_p3 = scmp.ne.s32.totalorder %s2102_s8, 0  ;;  %s1240_s19 = scalar_lea.sflag [#allocation4], %s1239_s26 }
0x1756   : > { %p1530_p4 = pnand %p1535_p2, %p2111_p3 }
0x1758   : > { %1701 = dma.done.wait (!%p1530_p4), %s1240_s19, 128  }
0x1759   : > { %1703 = vsyncadd (!%p1530_p4), %s1240_s19, 4294967168  ;;  %p17_p7 = scmp.ge.s32.totalorder %s1797_s27, 4   ;;  %s2112_s21 = smov %s1710_s22 }
0x175a   : > { %s2113_s22 = smov %s1714_s23  ;;  %s2114_s23 = smov %s1808_s30 }
0x175b   : > { %s2115_s24 = smov %s1797_s27  ;;  %19 = sbr.rel (!%p17_p7) target bundleno = 4 (0x4), region = 84 }
0x1762   :  { %1245 = vsyncpa [#allocation3], 1 }
0x1763   :  { %1247 = vsyncpa [#allocation3 + $0x1], 1 }
0x1764   :  { %1248 = vsyncpa [#allocation4], 1 }
0x1765   :  { %1250 = vsyncpa [#allocation4 + $0x1], 1 }

</bundles_post_ra>
